<compile_context>
chip_gen: v6e
topology: v6e:2x2x1
jax: 0.10.0
libtpu: 0.0.40
codegen_flags: <defaults>
</compile_context>

<pallas_src>
import functools

import jax
import jax.numpy as jnp
from jax.experimental import pallas as pl
from jax.experimental.pallas import tpu as pltpu


def _round_up(x, m):
    return ((x + m - 1) // m) * m


def _patch_embed_kernel(x_ref, w_ref, b_ref, o_ref):
    # x_ref: (tm, K) bf16 patch rows ; w_ref: (K, N) bf16 ; b_ref: (1, N) f32
    acc = jnp.dot(x_ref[...], w_ref[...], preferred_element_type=jnp.float32)
    o_ref[...] = (acc + b_ref[...]).astype(o_ref.dtype)


def _choose_tm(M, K, N, in_itemsize, out_itemsize, budget_bytes=40 * 1024 * 1024):
    """Pick the M tile: large, multiple of 16, dividing M exactly when possible,
    leaving >= 2 grid steps (v7x megacore) and fitting a VMEM budget."""
    fixed = 2 * (K * N * in_itemsize + N * 4)            # weight + bias (dbl-buffered)
    per_row = 2 * (K * in_itemsize + N * out_itemsize)   # dbl-buffered in + out rows
    cap = int(max(16, min(2048, (budget_bytes - fixed) // max(per_row, 1))))

    if M <= 16:
        return M, M  # single tiny step; block dim == full array dim is legal

    # Largest multiple of 16 that divides M, <= cap, leaving >= 2 grid steps.
    best = 0
    hi = min(cap, M // 2)
    for tm in range(16, hi + 1, 16):
        if M % tm == 0:
            best = tm
    if best:
        return best, M

    # Fallback: pad M up to a multiple of a 16-aligned tile.
    tm = min(cap, _round_up(M, 16))
    tm = max(16, (tm // 16) * 16)
    return tm, _round_up(M, tm)


def _vmem_limit(vmem_needed):
    cap = 64 * 1024 * 1024
    try:
        info = pltpu.get_tpu_info()
        cap = int(getattr(info, "vmem_capacity_bytes", cap) or cap)
    except Exception:
        pass
    # Leave headroom for Mosaic internal scratch/semaphores (esp. v7x: 64 MiB/TC).
    ceiling = (cap * 3) // 4
    return int(min(max(2 * vmem_needed, 32 * 1024 * 1024), ceiling))


def _patch_embed_matmul(patches, weight, bias, *, tm, out_dtype):
    """patches: (Mp, K) bf16, weight: (K, N) bf16, bias: (1, N) f32 -> (Mp, N)."""
    Mp, K = patches.shape
    _, N = weight.shape
    grid = (Mp // tm,)

    out_bytes = jnp.dtype(out_dtype).itemsize
    flops = 2 * Mp * K * N
    bytes_accessed = (
        Mp * K * patches.dtype.itemsize
        + K * N * weight.dtype.itemsize
        + N * bias.dtype.itemsize
        + Mp * N * out_bytes
    )
    vmem_needed = 2 * (
        tm * K * patches.dtype.itemsize
        + K * N * weight.dtype.itemsize
        + N * bias.dtype.itemsize
        + tm * N * out_bytes
    )

    return pl.pallas_call(
        _patch_embed_kernel,
        out_shape=jax.ShapeDtypeStruct((Mp, N), out_dtype),
        grid_spec=pltpu.PrefetchScalarGridSpec(
            num_scalar_prefetch=0,
            grid=grid,
            in_specs=[
                pl.BlockSpec((tm, K), lambda i: (i, 0)),
                pl.BlockSpec((K, N), lambda i: (0, 0)),  # weight: VMEM-resident
                pl.BlockSpec((1, N), lambda i: (0, 0)),  # bias:   VMEM-resident
            ],
            out_specs=pl.BlockSpec((tm, N), lambda i: (i, 0)),
        ),
        compiler_params=pltpu.CompilerParams(
            dimension_semantics=("parallel",),
            vmem_limit_bytes=_vmem_limit(vmem_needed),
            # Fuse the patch-extraction transpose/reshape/cast into the pallas
            # input read (no HBM round trip of the patch matrix).
            allow_input_fusion=[True, False, False],
        ),
        cost_estimate=pl.CostEstimate(
            flops=flops, transcendentals=0, bytes_accessed=bytes_accessed
        ),
    )(patches, weight, bias)


def cnn_patch_embed(
    x,
    weight,
    bias,
    *,
    patch_size,
    compute_dtype=jnp.bfloat16,   # explicit precision knob (MXU input dtype)
    out_dtype=jnp.bfloat16,       # store dtype (keeps f32 accumulate + bias)
):
    """Equivalent of CnnPatchEmbed.forward.

    x:      (B, 3, H, W)            (NCHW, like PyTorch)
    weight: (emb_dim, 3, P, P)      (PyTorch Conv2d weight layout)
    bias:   (emb_dim,)
    returns (B, (H//P)*(W//P), emb_dim)
    """
    B, C, H, W = x.shape
    P = patch_size
    emb_dim = weight.shape[0]
    hp, wp = H // P, W // P
    M, K, N = B * hp * wp, C * P * P, emb_dim

    in_itemsize = jnp.dtype(compute_dtype).itemsize
    out_itemsize = jnp.dtype(out_dtype).itemsize
    tm, Mp = _choose_tm(M, K, N, in_itemsize, out_itemsize)

    # --- patch extraction (layout only): cast first, then non-overlapping
    # patches in (c, ki, kj) element order. With allow_input_fusion this chain
    # feeds the kernel's input DMA instead of materializing in HBM. K and N are
    # intentionally NOT padded to 128 (block dims equal full array dims).
    xp = x.astype(compute_dtype).reshape(B, C, hp, P, wp, P)
    xp = jnp.transpose(xp, (0, 2, 4, 1, 3, 5))            # (B, hp, wp, C, P, P)
    patches = xp.reshape(M, K)
    if Mp != M:                                           # rare fallback path
        patches = jnp.pad(patches, ((0, Mp - M), (0, 0)))

    # Conv2d weight (emb, C, P, P) -> (K, emb) with matching (c, ki, kj) order.
    w_mat = weight.reshape(emb_dim, K).T.astype(compute_dtype)   # (K, N)
    b_mat = bias.reshape(1, N).astype(jnp.float32)

    # --- hot path in Pallas ---
    out = _patch_embed_matmul(patches, w_mat, b_mat, tm=tm, out_dtype=out_dtype)
    if Mp != M:
        out = out[:M]
    return out.reshape(B, hp * wp, emb_dim)               # b (p1 p2) c


if __name__ == "__main__":
    # small, module-consistent shapes: B=2, C=3 (fixed by Conv2d(3,...)),
    # H=W=16, patch_size=4 -> 16 patches, emb_dim=32
    B, C, H, W = 2, 3, 16, 16
    patch_size = 4
    emb_dim = 32

    key = jax.random.PRNGKey(0)
    kx, kw, kb = jax.random.split(key, 3)
    x = jax.random.normal(kx, (B, C, H, W), dtype=jnp.float32)
    weight = jax.random.normal(
        kw, (emb_dim, C, patch_size, patch_size), dtype=jnp.float32
    ) * 0.02
    bias = jax.random.normal(kb, (emb_dim,), dtype=jnp.float32) * 0.02

    fn = jax.jit(functools.partial(cnn_patch_embed, patch_size=patch_size))
    out = fn(x, weight, bias)
    jax.block_until_ready(out)

    # sanity check against plain-JAX reference (lax conv, f32)
    ref = jax.lax.conv_general_dilated(
        x, weight,
        window_strides=(patch_size, patch_size),
        padding="VALID",
        dimension_numbers=("NCHW", "OIHW", "NCHW"),
    ) + bias[None, :, None, None]
    ref = jnp.transpose(
        ref.reshape(B, emb_dim, -1), (0, 2, 1)
    )  # b c p1 p2 -> b (p1 p2) c

    assert out.shape == (B, (H // patch_size) * (W // patch_size), emb_dim)
    assert out.dtype == jnp.bfloat16
    # bf16 MXU inputs + bf16 store with f32 accumulation -> loosened tolerance
    assert jnp.allclose(out.astype(jnp.float32), ref, atol=2e-2, rtol=2e-2)

    print("KERNEL_OK")
</pallas_src>

<mosaic_0001>
module attributes {stable_mosaic.version = 11 : i64} {
  func.func @_patch_embed_kernel(%arg0: i32, %arg1: memref<16x48xbf16, #tpu.memory_space<vmem>>, %arg2: memref<48x32xbf16, #tpu.memory_space<vmem>>, %arg3: memref<1x32xf32, #tpu.memory_space<vmem>>, %arg4: memref<16x32xbf16, #tpu.memory_space<vmem>>) attributes {dimension_semantics = [#tpu.dimension_semantics<parallel>], iteration_bounds = array<i64: 2>, scalar_prefetch = 0 : i64, scratch_operands = 0 : i64, tpu.core_type = #tpu.core_type<tc>, window_params = [{transform_indices = @transform_0, window_bounds = array<i64: 16, 48>}, {pipeline_mode = #tpu.pipeline_mode<synchronous>, transform_indices = @transform_1, window_bounds = array<i64: 48, 32>}, {pipeline_mode = #tpu.pipeline_mode<synchronous>, transform_indices = @transform_2, window_bounds = array<i64: 1, 32>}, {transform_indices = @transform_3, window_bounds = array<i64: 16, 32>}]} {
    %c0 = arith.constant 0 : index
    %c0_0 = arith.constant 0 : index
    %0 = vector.load %arg1[%c0, %c0_0] : memref<16x48xbf16, #tpu.memory_space<vmem>>, vector<16x48xbf16>
    %c0_1 = arith.constant 0 : index
    %c0_2 = arith.constant 0 : index
    %1 = vector.load %arg2[%c0_1, %c0_2] : memref<48x32xbf16, #tpu.memory_space<vmem>>, vector<48x32xbf16>
    %cst = arith.constant dense<0.000000e+00> : vector<16x32xf32>
    %2 = tpu.matmul %0, %1, %cst {dimension_numbers = #tpu.dot_dimension_numbers<[1], [0], [0], [1], [0, 0, 1, 1], [], []>} : vector<16x48xbf16>, vector<48x32xbf16>, vector<16x32xf32> -> vector<16x32xf32>
    %c0_3 = arith.constant 0 : index
    %c0_4 = arith.constant 0 : index
    %3 = vector.load %arg3[%c0_3, %c0_4] : memref<1x32xf32, #tpu.memory_space<vmem>>, vector<1x32xf32>
    %4 = vector.broadcast %3 : vector<1x32xf32> to vector<16x32xf32>
    %5 = arith.addf %2, %4 : vector<16x32xf32>
    %6 = arith.truncf %5 : vector<16x32xf32> to vector<16x32xbf16>
    %c0_5 = arith.constant 0 : index
    %c0_6 = arith.constant 0 : index
    %7 = vector.load %arg4[%c0_5, %c0_6] : memref<16x32xbf16, #tpu.memory_space<vmem>>, vector<16x32xbf16>
    tpu.vector_store %arg4[%c0_5, %c0_6], %6 {strides = array<i32>} : memref<16x32xbf16, #tpu.memory_space<vmem>>, vector<16x32xbf16>,
    return
  }
  func.func @transform_0(%arg0: i32) -> (i32, i32) {
    %c0_i32 = arith.constant 0 : i32
    %c0_i32_0 = arith.constant 0 : i32
    return %arg0, %c0_i32 : i32, i32
  }
  func.func @transform_1(%arg0: i32) -> (i32, i32) {
    %c0_i32 = arith.constant 0 : i32
    %c0_i32_0 = arith.constant 0 : i32
    %c0_i32_1 = arith.constant 0 : i32
    return %c0_i32, %c0_i32_0 : i32, i32
  }
  func.func @transform_2(%arg0: i32) -> (i32, i32) {
    %c0_i32 = arith.constant 0 : i32
    %c0_i32_0 = arith.constant 0 : i32
    %c0_i32_1 = arith.constant 0 : i32
    return %c0_i32, %c0_i32_0 : i32, i32
  }
  func.func @transform_3(%arg0: i32) -> (i32, i32) {
    %c0_i32 = arith.constant 0 : i32
    %c0_i32_0 = arith.constant 0 : i32
    return %arg0, %c0_i32 : i32, i32
  }
}

</mosaic_0001>

<bundles_post_ra>
// kernel: cnn_patch_embed.1
= control target key start
LH: loop header
LB: loop body
LE: loop exit
PB: predicated region body
PF: predicated region fallthrough
CT: control target
= control target key end

     0   :  { %8 = vsyncpa [#allocation3], 0  ;;  %s627_s0 = inlined_call_operand.vmem [shape: bf16[32,48], index: 0, kind: input, shape index: {}]   ;;  %s628_s1 = inlined_call_operand.vmem [shape: bf16[48,32], index: 1, kind: input, shape index: {}]   ;;  %s629_s2 = inlined_call_operand.vmem [shape: f32[1,32], index: 2, kind: input, shape index: {}]   ;;  %s630_s3 = inlined_call_operand.hbm [shape: bf16[32,32], index: 3, kind: output, shape index: {}]  }
   0x1   :  { %10 = vsyncpa [#allocation3 + $0x1], 0  ;;  %s514_s12 = smov 0   ;;  %s516_s13 = smov 0  }
   0x2   :  { %s518_s14 = smov 0   ;;  %s520_s15 = smov 0  }
   0x3 LB: > { %s535_s16 = sadd.s32 4294967295, %s487_s15   ;;  %s343_s17 = sadd.s32 4294967294, %s487_s15   ;;  %s487_s15 = sphi %s520_s15, %s636_s15   ;;  %s483_s14 = sphi %s518_s14, %s635_s14   ;;  %s479_s13 = sphi %s516_s13, %s634_s13   ;;  %s475_s12 = sphi %s514_s12, %s633_s12  }
   0x4   : > { %s539_s18 = sadd.s32 1, %s487_s15   ;;  %s91_s19 = sadd.s32 1, %s483_s14 }
   0x5   : > { %s88_s20 = ssub.s32 %s487_s15, %s539_s18  ;;  %p101_p0 = scmp.ne.s32.totalorder %s483_s14, %s479_s13 }
   0x6   : > { %p89_p1 = scmp.eq.s32.totalorder %s88_s20, 0  ;;  %p102_p2 = scmp.eq.s32.totalorder %s535_s16, 1 }
   0x7   : > { %p107_p3 = scmp.ne.s32.totalorder %s479_s13, %s475_s12  ;;  %p108_p4 = scmp.eq.s32.totalorder %s343_s17, 1 }
   0x8   : > { %s550_s21 = scalar_select %p89_p1, %s483_s14, %s91_s19  }
   0x9   : > { %p552_p5 = por %p102_p2, %p101_p0  ;;  %p556_p6 = por %p108_p4, %p107_p3 }
   0xa   : > { %p346_p7 = scmp.ge.s32.totalorder %s487_s15, 1  ;;  %p141_p8 = scmp.lt.s32.totalorder %s487_s15, 3 }
   0xc   : > { %p142_p9 = pnand %p346_p7, %p141_p8 }
   0xd   : > { %s348_s28 = sshll.u32 (!%p142_p9), %s535_s16, 1  ;;  %s162_s8 = sand.u32 (!%p142_p9), 1, %s479_s13  }
   0xe   : > { %145 = sbr.rel (%p142_p9) target bundleno = 247 (0xf7), region = 32  ;;  %p166_p10 = scmp.lt.s32.totalorder (!%p142_p9), %s348_s28, 3 }
   0xf   : > { %s347_s11 = sshll.u32 (!%p142_p9), %s162_s8, 3  ;;  %s365_s20 = sshll.u32 (!%p142_p9), %s535_s16, 7 }
  0x10   : > { %s164_s17 = scalar_lea.vmem (!%p142_p9), [#allocation2], %s347_s11  ;;  %s585_s26 = scalar_lea.hbm (!%p142_p9), %s630_s3, %s365_s20 }
  0x11   : > { %s281_s19 = sshll.u32 (!%p142_p9), %s164_s17, 4  ;;  %s587_s27 = scalar_lea.sflag (!%p142_p9), [#allocation3], %s162_s8  ;;  %s580_s19 = int_to_ptr.vmem [resolvable:$true] %s281_s19 }
  0x12   : > { %s491_s16 = smov (!%p142_p9), [#allocation2]  }
  0x13   : > { %v423_v0 = vld [vmem:[%s628_s1 + $0x10] sm:$0xff]   ;;  %v489_v1 = vmov 0.0   ;;  %v424_v2 = vld [vmem:[%s628_s1 + $0x8] sm:$0xff]   ;;  %vm490_vm0 = vmmov 0   ;;  %s638_s28 = smov (!%p166_p10, %s348_s28), 3  ;;  %v425_v3 = vld [vmem:[%s628_s1] sm:$0xff]  }
  0x14   : > { %370 = vmatprep.subr.bf16.mxu0 %v489_v1  ;;  %376 = vmatprep.mubr.msk.bf16.mxu0 %vm490_vm0, %v489_v1  ;;  %s349_s4 = sshll.u32 %s638_s28, 2  ;;  %vm211_vm1 = vcmask 392192   ;;  %v350_v5 = vld [vmem:[%s629_s2] ss:$0 sm:$0xff]  ;;  %vm264_vm2 = vcmask 257024   ;;  %s427_s28 = scalar_lea.vmem %s580_s19, 128 }
  0x15   : > { %371 = vmatpush3.bf16.msra.mxu0 %v423_v0  ;;  %s169_s7 = scalar_lea.vmem %s627_s0, %s349_s4  ;;  %p428_p11 = scmp.ne.s32.totalorder %s580_s19, %s427_s28 }
  0x16   : > { %372 = vmatprep.subr.bf16.mxu0 %v489_v1  ;;  %v426_v4 = vld [vmem:[%s169_s7] sm:$0xff]   ;;  %s431_s29 = sshll.u32 %s491_s16, 4  ;;  %s432_s29 = int_to_ptr.vmem [resolvable:$false] %s431_s29 }
  0x17   : > { %p429_p12 = pnand %p428_p11, %p552_p5  ;;  %s433_s30 = scalar_lea.vmem %s432_s29, 256 }
  0x18   : > { %p434_p0 = scmp.lt.s32.totalorder %s580_s19, %s432_s29  ;;  %p435_p1 = scmp.lt.s32.totalorder %s433_s30, %s427_s28 }
  0x19   : > { %373 = vmatpush3.bf16.msra.mxu0 %v424_v2  ;;  %p430_p13 = pneg %p429_p12 }
  0x1a   : > { %374 = vmatprep.subr.bf16.mxu0 %v489_v1  ;;  %p436_p2 = por %p435_p1, %p434_p0 }
  0x1c   : > { %p437_p3 = pnand %p436_p2, %p430_p13 }
  0x1d   : > { %375 = vmatpush3.bf16.msra.mxu0 %v425_v3 }
  0x20   : > { %377 = vmatmul.mubr.msk.bf16.vlgmr.msra.gmra.mxu0 %vm211_vm1, %v426_v4 }
  0xe0   : > { %v249_v6 = vpop.f32.mrf.mxu0 }
  0xe1   : > { %v250_v7 = vadd.f32 %v350_v5, %v249_v6 }
  0xe2   : > { %v378_v8 = vpop.f32.mrf.mxu0 }
  0xe3   : > { %v363_v9 = vpack.c.bf16 %v250_v7, %v250_v7 }
  0xe4   : > { %v252_v10 = vpop.f32.mrf.mxu0 }
  0xe5   : > { %265 = vst.msk [vmem:[%s164_s17] sm:$0xf] %vm264_vm2, %v363_v9  ;;  %v253_v11 = vadd.f32 %v350_v5, %v252_v10 }
  0xe6   : > { %v379_v12 = vpop.f32.mrf.mxu0 }
  0xe7   : > { %v364_v13 = vpack.c.bf16 %v253_v11, %v253_v11 }
  0xe9   : > { %266 = vst.msk [vmem:[%s164_s17 + $0x4] sm:$0xf] %vm264_vm2, %v364_v13 }
  0xea   : > { %440 = shalt.err (!%p437_p3)
}
  0xeb   : > { %s441_s4 = scalar_lea.hbm %s585_s26, 128  ;;  %s445_s7 = scalar_lea.hbm %s630_s3, 256 }
  0xec   : > { %p442_p4 = scmp.ne.s32.totalorder %s585_s26, %s441_s4  ;;  %p446_p9 = scmp.lt.s32.totalorder %s585_s26, %s630_s3 }
  0xed   : > { %p447_p10 = scmp.lt.s32.totalorder %s445_s7, %s441_s4 }
  0xee   : > { %p443_p7 = pnand %p442_p4, %p552_p5 }
  0xef   : > { %p448_p11 = por %p447_p10, %p446_p9 }
  0xf0   : > { %p444_p8 = pneg %p443_p7 }
  0xf2   : > { %p449_p12 = pnand %p448_p11, %p444_p8 }
  0xf4   : > { %452 = shalt.err (!%p449_p12)
}
  0xf5   : > { %s492_s10 = smov 64   ;;  %s493_s11 = smov 4  }
  0xf6   : > { %380 = dma.vmem_to_hbm [thread:$0]  (%p552_p5), %s580_s19, 128, %s585_s26, %s587_s27, %s492_s10, %s492_s10, %s493_s11  }
  0xf7 PF: > { %p386_p13 = scmp.ge.s32.totalorder %s487_s15, 2  ;;  %s296_s17 = sand.u32 1, %s475_s12  }
  0xf8   : > { %s297_s20 = scalar_lea.sflag [#allocation3], %s296_s17 }
  0xf9   : > { %p383_p0 = pnand %p386_p13, %p556_p6 }
  0xfb   : > { %p384_p1 = pneg %p383_p0 }
  0xfd   : > { %470 = dma.done.wait (%p384_p1), %s297_s20, 128  }
  0xfe   : > { %472 = vsyncadd (%p384_p1), %s297_s20, 4294967168  ;;  %p13_p2 = scmp.ge.s32.totalorder %s539_s18, 4   ;;  %s633_s12 = smov %s479_s13 }
  0xff   : > { %s634_s13 = smov %s483_s14  ;;  %s635_s14 = smov %s550_s21 }
 0x100   : > { %s636_s15 = smov %s539_s18  ;;  %15 = sbr.rel (!%p13_p2) target bundleno = 3 (0x3), region = 67 }
 0x105   :  { %302 = vsyncpa [#allocation3], 1 }
 0x106   :  { %304 = vsyncpa [#allocation3 + $0x1], 1 }

</bundles_post_ra>
